<compile_context>
chip_gen: v5e
topology: v5e:2x2
jax: 0.10.0
libtpu: 0.0.40
codegen_flags: <defaults>
</compile_context>

<pallas_src>
import math
import jax
import jax.numpy as jnp
from jax.experimental import pallas as pl
from jax.experimental.pallas import tpu as pltpu

# ----- static config (consistent with the module) -----
INPUT_SIZE = 32
OUTPUT_SIZE = 32
D_ORDER = 3                       # number of higher-order Taylor terms ("d")

_MAX_TILE_B = 4096                # rows per tile for large batches (~4 MB live VMEM)
_PARALLEL_MIN_ROWS_PER_TC = 4096  # only shard across TCs (v7x) above this per-core load


def taylor_kernel(x_ref, wall_ref, d0_ref, out_ref):
    # x_ref:    (TB, I)          batch tile
    # wall_ref: (I, (D+1)*O)     fused, pre-transposed [W1 | Dn0 | ... | Dn_{D-1}]
    # d0_ref:   (1, O)
    # out_ref:  (TB, O)
    x = x_ref[...]                                                      # (TB, I)
    # One lane-dense MXU matmul computes all (D+1) linear terms at once.
    s = jnp.dot(x, wall_ref[...], preferred_element_type=jnp.float32)  # (TB, (D+1)*O)

    o = out_ref.shape[-1]
    n_terms = s.shape[-1] // o                                  # D + 1, static
    chunks = [s[:, k * o:(k + 1) * o] for k in range(n_terms)]  # static lane slices
    # TODO(synk): if this kernel ever becomes VPU-bound at huge B, switch the
    # 32-lane Horner slices to a full-128-lane formulation (pltpu.roll prefix
    # products); at current sizes the kernel is overhead/DMA bound.

    if n_terms == 1:
        out_ref[...] = d0_ref[...] + chunks[0]
    else:
        # Horner form of: s0 + s0*s1 + s0*s1*s2 + ... (short VPU dep chain).
        acc = 1.0 + chunks[n_terms - 1]
        for k in range(n_terms - 2, 0, -1):                     # static unroll
            acc = 1.0 + chunks[k] * acc
        out_ref[...] = d0_ref[...] + chunks[0] * acc


def fuse_weights(w1, dn):
    """One-time parameter plumbing (call at setup, NOT per forward):
    concat [W1; Dn0; ...; Dn_{D-1}] along the output dim and pre-transpose
    into a single lane-dense (I, (D+1)*O) RHS for the MXU."""
    D, O, I = dn.shape
    return jnp.concatenate([w1, dn.reshape(D * O, I)], axis=0).T


def taylor_linear_net(x, w_all, d0):
    """Forward pass. `w_all` is the pre-fused weight from fuse_weights()."""
    B, I = x.shape
    O = d0.shape[-1]
    n_lanes = w_all.shape[-1]          # (D+1)*O

    # --- tiling decision (all shapes are static under jit) ---
    if B <= _MAX_TILE_B:
        tile_b = B                     # single tile: no per-grid-step overhead
        pad_b = 0
    else:
        tile_b = _MAX_TILE_B           # big tiles, not 128-row ones
        rem = B % tile_b
        pad_b = 0 if rem == 0 else tile_b - rem
        if pad_b:                      # pad ragged batch instead of one huge tile
            x = jnp.pad(x, ((0, pad_b), (0, 0)))
    Bp = B + pad_b
    grid = (Bp // tile_b,)

    # Only split the batch across the two TensorCores (v7x) when each core
    # gets real streaming work; otherwise the duplicated prologue/DMA loses.
    use_parallel = (grid[0] >= 2) and (tile_b >= _PARALLEL_MIN_ROWS_PER_TC)
    dim_sem = ("parallel",) if use_parallel else ("arbitrary",)

    cost = pl.CostEstimate(
        flops=2 * Bp * I * n_lanes + 2 * Bp * n_lanes,   # matmul + Horner epilogue
        transcendentals=0,
        bytes_accessed=4 * (Bp * I + I * n_lanes + O + Bp * O),
    )

    out = pl.pallas_call(
        taylor_kernel,
        out_shape=jax.ShapeDtypeStruct((Bp, O), jnp.float32),
        grid=grid,
        in_specs=[
            pl.BlockSpec((tile_b, I), lambda b: (b, 0)),        # x batch tile
            pl.BlockSpec((I, n_lanes), lambda b: (0, 0)),       # fused weights (resident)
            pl.BlockSpec((1, O), lambda b: (0, 0)),             # d0 (resident)
        ],
        out_specs=pl.BlockSpec((tile_b, O), lambda b: (b, 0)),
        compiler_params=pltpu.CompilerParams(
            dimension_semantics=dim_sem,
            vmem_limit_bytes=32 * 1024 * 1024,                  # safe on v5e/v6e/v7x
        ),
        cost_estimate=cost,
    )(x, w_all, d0)

    if pad_b:
        out = out[:B]
    return out


def init_params(key, input_size=INPUT_SIZE, output_size=OUTPUT_SIZE, d=D_ORDER):
    """Deterministic kaiming_uniform(a=sqrt(5))-style init (bound = 1/sqrt(fan_in))."""
    k1, k2, k3 = jax.random.split(key, 3)
    bound = 1.0 / math.sqrt(input_size)
    # d1t: Linear(input_size, output_size, bias=False) -> weight (O, I)
    w1 = jax.random.uniform(k1, (output_size, input_size), jnp.float32,
                            minval=-bound, maxval=bound)
    # dn[k][1]: Parameter (O, I)
    dn = jax.random.uniform(k2, (d, output_size, input_size), jnp.float32,
                            minval=-bound, maxval=bound)
    # d0: Parameter (1, O), fan_in = O
    bound_d0 = 1.0 / math.sqrt(output_size)
    d0 = jax.random.uniform(k3, (1, output_size), jnp.float32,
                            minval=-bound_d0, maxval=bound_d0)
    # NOTE: self.l0 and dn[k][0] (the 1-output Linears) are unused in forward().
    return w1, dn, d0


def reference(x, w1, dn, d0):
    """Pure-JAX reference reproducing the PyTorch forward exactly."""
    d1t = x @ w1.T
    res = d0 + d1t
    tmp = d1t
    for k in range(dn.shape[0]):
        tmp = tmp * (x @ dn[k].T)
        res = res + tmp
    return res


if __name__ == "__main__":
    key = jax.random.PRNGKey(0)
    kx, kp = jax.random.split(key)

    batch = 8  # small deterministic example
    x = jax.random.normal(kx, (batch, INPUT_SIZE), jnp.float32)
    w1, dn, d0 = init_params(kp)

    # Weight fusion is hoisted out of the hot path: done once at setup.
    w_all = fuse_weights(w1, dn)

    fwd = jax.jit(taylor_linear_net)
    out = jax.block_until_ready(fwd(x, w_all, d0))

    ref = reference(x, w1, dn, d0)
    assert out.shape == (batch, OUTPUT_SIZE)
    assert jnp.allclose(out, ref, atol=1e-4, rtol=1e-4)
    print("KERNEL_OK")
</pallas_src>

<mosaic_0001>
module attributes {stable_mosaic.version = 11 : i64} {
  func.func @taylor_kernel(%arg0: i32, %arg1: memref<8x32xf32, #tpu.memory_space<vmem>>, %arg2: memref<32x128xf32, #tpu.memory_space<vmem>>, %arg3: memref<1x32xf32, #tpu.memory_space<vmem>>, %arg4: memref<8x32xf32, #tpu.memory_space<vmem>>) attributes {dimension_semantics = [#tpu.dimension_semantics<arbitrary>], iteration_bounds = array<i64: 1>, scalar_prefetch = 0 : i64, scratch_operands = 0 : i64, tpu.core_type = #tpu.core_type<tc>, window_params = [{transform_indices = @transform_0, window_bounds = array<i64: 8, 32>}, {pipeline_mode = #tpu.pipeline_mode<synchronous>, transform_indices = @transform_1, window_bounds = array<i64: 32, 128>}, {pipeline_mode = #tpu.pipeline_mode<synchronous>, transform_indices = @transform_2, window_bounds = array<i64: 1, 32>}, {transform_indices = @transform_3, window_bounds = array<i64: 8, 32>}]} {
    %c0 = arith.constant 0 : index
    %c0_0 = arith.constant 0 : index
    %0 = vector.load %arg1[%c0, %c0_0] : memref<8x32xf32, #tpu.memory_space<vmem>>, vector<8x32xf32>
    %c0_1 = arith.constant 0 : index
    %c0_2 = arith.constant 0 : index
    %1 = vector.load %arg2[%c0_1, %c0_2] : memref<32x128xf32, #tpu.memory_space<vmem>>, vector<32x128xf32>
    %cst = arith.constant dense<0.000000e+00> : vector<8x128xf32>
    %2 = tpu.matmul %0, %1, %cst {dimension_numbers = #tpu.dot_dimension_numbers<[1], [0], [0], [1], [0, 0, 1, 1], [], []>} : vector<8x32xf32>, vector<32x128xf32>, vector<8x128xf32> -> vector<8x128xf32>
    %3 = vector.extract_strided_slice %2 {offsets = [0, 0], sizes = [8, 32], strides = [1, 1]} : vector<8x128xf32> to vector<8x32xf32>
    %4 = vector.extract_strided_slice %2 {offsets = [0, 32], sizes = [8, 32], strides = [1, 1]} : vector<8x128xf32> to vector<8x32xf32>
    %5 = vector.extract_strided_slice %2 {offsets = [0, 64], sizes = [8, 32], strides = [1, 1]} : vector<8x128xf32> to vector<8x32xf32>
    %6 = vector.extract_strided_slice %2 {offsets = [0, 96], sizes = [8, 32], strides = [1, 1]} : vector<8x128xf32> to vector<8x32xf32>
    %cst_3 = arith.constant 1.000000e+00 : f32
    %7 = vector.broadcast %cst_3 : f32 to vector<8x32xf32>
    %8 = arith.addf %7, %6 : vector<8x32xf32>
    %9 = arith.mulf %5, %8 : vector<8x32xf32>
    %cst_4 = arith.constant 1.000000e+00 : f32
    %10 = vector.broadcast %cst_4 : f32 to vector<8x32xf32>
    %11 = arith.addf %10, %9 : vector<8x32xf32>
    %12 = arith.mulf %4, %11 : vector<8x32xf32>
    %cst_5 = arith.constant 1.000000e+00 : f32
    %13 = vector.broadcast %cst_5 : f32 to vector<8x32xf32>
    %14 = arith.addf %13, %12 : vector<8x32xf32>
    %c0_6 = arith.constant 0 : index
    %c0_7 = arith.constant 0 : index
    %15 = vector.load %arg3[%c0_6, %c0_7] : memref<1x32xf32, #tpu.memory_space<vmem>>, vector<1x32xf32>
    %16 = arith.mulf %3, %14 : vector<8x32xf32>
    %17 = vector.broadcast %15 : vector<1x32xf32> to vector<8x32xf32>
    %18 = arith.addf %17, %16 : vector<8x32xf32>
    %c0_8 = arith.constant 0 : index
    %c0_9 = arith.constant 0 : index
    %19 = vector.load %arg4[%c0_8, %c0_9] : memref<8x32xf32, #tpu.memory_space<vmem>>, vector<8x32xf32>
    tpu.vector_store %arg4[%c0_8, %c0_9], %18 {strides = array<i32>} : memref<8x32xf32, #tpu.memory_space<vmem>>, vector<8x32xf32>,
    return
  }
  func.func @transform_0(%arg0: i32) -> (i32, i32) {
    %c0_i32 = arith.constant 0 : i32
    %c0_i32_0 = arith.constant 0 : i32
    return %arg0, %c0_i32 : i32, i32
  }
  func.func @transform_1(%arg0: i32) -> (i32, i32) {
    %c0_i32 = arith.constant 0 : i32
    %c0_i32_0 = arith.constant 0 : i32
    %c0_i32_1 = arith.constant 0 : i32
    return %c0_i32, %c0_i32_0 : i32, i32
  }
  func.func @transform_2(%arg0: i32) -> (i32, i32) {
    %c0_i32 = arith.constant 0 : i32
    %c0_i32_0 = arith.constant 0 : i32
    %c0_i32_1 = arith.constant 0 : i32
    return %c0_i32, %c0_i32_0 : i32, i32
  }
  func.func @transform_3(%arg0: i32) -> (i32, i32) {
    %c0_i32 = arith.constant 0 : i32
    %c0_i32_0 = arith.constant 0 : i32
    return %arg0, %c0_i32 : i32, i32
  }
}

</mosaic_0001>

<bundles_post_ra>
// kernel: taylor_linear_net.1
= control target key start
LH: loop header
LB: loop body
LE: loop exit
PB: predicated region body
PF: predicated region fallthrough
CT: control target
= control target key end

     0   :  { %8 = vsyncpa [#allocation3], 0  ;;  %s242_s0 = inlined_call_operand.hbm [shape: f32[8,32], index: 0, kind: input, shape index: {}]   ;;  %s243_s1 = inlined_call_operand.hbm [shape: f32[32,128], index: 1, kind: input, shape index: {}]   ;;  %s244_s2 = inlined_call_operand.vmem [shape: f32[1,32], index: 2, kind: input, shape index: {}]   ;;  %s245_s3 = inlined_call_operand.hbm [shape: f32[8,32], index: 3, kind: output, shape index: {}]  }
   0x1   :  { %9 = vsyncpa [#allocation6], 0 }
   0x2   :  { %10 = vsyncpa [#allocation4], 0  ;;  %s16_s14 = sshll.u32 %s242_s0, 4  ;;  %s202_s15 = smov [#allocation2]   ;;  %s17_s14 = int_to_ptr.hbm [resolvable:$true] %s16_s14 }
   0x3   :  { %s18_s16 = sshll.u32 %s202_s15, 4  ;;  %s26_s19 = sshll.u32 %s243_s1, 4  ;;  %s19_s16 = int_to_ptr.vmem [resolvable:$true] %s18_s16  ;;  %s27_s19 = int_to_ptr.hbm [resolvable:$true] %s26_s19 }
   0x4   :  { %21 = dma.hbm_to_vmem [thread:$0]  %s17_s14, 128, %s19_s16, [#allocation3]  }
   0x5   :  { %s203_s20 = smov [#allocation5]   ;;  %s204_s22 = smov 128  }
   0x6   :  { %s28_s21 = sshll.u32 %s203_s20, 4  ;;  %s205_s23 = smov 8   ;;  %s29_s21 = int_to_ptr.vmem [resolvable:$true] %s28_s21 }
   0x7   :  { %34 = dma.hbm_to_vmem [thread:$0]  %s27_s19, 512, %s29_s21, [#allocation6], %s204_s22, %s204_s22, %s205_s23  }
   0x8   :  { %196 = dma.done.wait [#allocation3], 128  }
   0x9   :  { %197 = vsyncadd [#allocation3], 4294967168 }
   0xa   :  { %198 = dma.done.wait [#allocation6], 512  }
   0xb   :  { %199 = vsyncadd [#allocation6], 4294966784  ;;  %v49_v0 = vld [vmem:[#allocation5 + $0x18] sm:$0xff]  ;;  %v48_v1 = vld [vmem:[#allocation5 + $0x10] sm:$0xff]  ;;  %vm50_vm0 = vcmask 261120   ;;  %s206_s0 = smov 96  }
   0xc   :  { %66 = vmatpush.msra.mxu0 %v49_v0  ;;  %v47_v2 = vld [vmem:[#allocation5 + $0x8] sm:$0xff]  ;;  %v46_v3 = vld [vmem:[#allocation5] sm:$0xff]  ;;  %v45_v4 = vld [vmem:[#allocation2] sm:$0xff]  ;;  %s207_s25 = smov [#allocation7]   ;;  %s105_s29 = sshll.u32 %s245_s3, 4  ;;  %s106_s29 = int_to_ptr.hbm [resolvable:$true] %s105_s29 }
   0xd   :  { %v123_v13 = vld [vmem:[%s244_s2] ss:$0 sm:$0xff]  ;;  %s103_s26 = sshll.u32 %s207_s25, 4  ;;  %s104_s26 = int_to_ptr.vmem [resolvable:$true] %s103_s26 }
   0xe   :  { %67 = vmatpush.msra.mxu0 %v48_v1 }
  0x10   :  { %68 = vmatpush.msra.mxu0 %v47_v2 }
  0x12   :  { %69 = vmatpush.msra.mxu0 %v46_v3 }
  0x13   :  { %116 = vmatmul.msk.f32.vlgmr.msra.gmra.mxu0 %vm50_vm0, %v45_v4 }
  0x90   :  { %v71_v5 = vpop.f32.mrf.mxu0 }
  0x91   :  { %v74_v6 = vadd.f32 1.0, %v71_v5 }
  0x93   :  { %76 = vrot.lane.b32.xlu0 %v74_v6, %s206_s0 }
 0x105   :  { %v77_v7 = vpop.permute.xlu0 %76 }
 0x106   :  { %v79_v8 = vmul.f32 %v77_v7, %v71_v5 }
 0x108   :  { %v80_v9 = vadd.f32 1.0, %v79_v8 }
 0x10a   :  { %82 = vrot.lane.b32.xlu0 %v80_v9, %s206_s0 }
 0x17c   :  { %v83_v10 = vpop.permute.xlu0 %82 }
 0x17d   :  { %v85_v11 = vmul.f32 %v83_v10, %v71_v5 }
 0x17f   :  { %v86_v12 = vadd.f32 1.0, %v85_v11 }
 0x181   :  { %89 = vrot.lane.b32.xlu1 %v86_v12, %s206_s0 }
 0x1f3   :  { %v90_v14 = vpop.permute.xlu1 %89 }
 0x1f4   :  { %v92_v15 = vmul.f32 %v90_v14, %v71_v5 }
 0x1f6   :  { %v96_v16 = vadd.f32 %v123_v13, %v92_v15 }
 0x1f8   :  { %97 = vst.msk [vmem:[#allocation7] sm:$0xff] %vm50_vm0, %v96_v16 }
 0x1f9   :  { %108 = dma.vmem_to_hbm [thread:$0]  %s104_s26, 128, %s106_s29, [#allocation4]  }
 0x1fa   :  { %200 = dma.done.wait [#allocation4], 128  }
 0x1fb   :  { %201 = vsyncadd [#allocation4], 4294967168 }
 0x1fc   :  { %113 = vsyncpa [#allocation3], 1 }
 0x1fd   :  { %114 = vsyncpa [#allocation6], 1 }
 0x1fe   :  { %115 = vsyncpa [#allocation4], 1 }

</bundles_post_ra>
